<compile_context>
chip_gen: v7x
topology: tpu7x:2x2x1
jax: 0.10.0
libtpu: 0.0.40
codegen_flags: <defaults>
</compile_context>

<pallas_src>
import functools
import math

import jax
import jax.numpy as jnp
from jax import lax
from jax.experimental import pallas as pl
from jax.experimental.pallas import tpu as pltpu

_HALF_LOG_2PI = 0.5 * math.log(2.0 * math.pi)
_LANE = 128
_SUBLANE = 8
_TARGET_BLOCK_BYTES = 12 * 1024 * 1024   # per x block (Pallas double-buffers it)
_VMEM_LIMIT_BYTES = 48 * 1024 * 1024     # 2*block + head carry + out << 48 MiB


def _round_up(x, m):
    return ((x + m - 1) // m) * m


def _cdiv(a, b):
    return -(-a // b)


def _ar1_kernel(x_ref, coef_ref, scale_ref, out_ref, *scratch,
                shift, cw, multi_chunk, n_chunks, rem):
    """One (trial-block, lane-chunk) grid step.

    Invariant: the lane-chunk axis is the LAST (innermost, sequential/'arbitrary')
    grid axis.  The carry scratch written at chunk j is consumed at chunk j+1 of the
    same trial block; it is never reset between trial blocks (the `j > 0` guard makes
    the stale value harmless).  Do not reorder the grid axes.
    """
    j = pl.program_id(1)

    # Output block is revisited across the (sequential) chunk axis -> init at j == 0.
    @pl.when(j == 0)
    def _init():
        out_ref[...] = jnp.zeros_like(out_ref)

    def accumulate(mask_tail):
        x = x_ref[...].astype(jnp.float32)               # (TT, LC)
        lc = x.shape[1]

        if mask_tail:
            # Last (ragged) chunk: lanes >= rem lie outside the real array; the VMEM
            # block holds undefined data there.  Zero them so 0 * garbage != NaN.
            lane = lax.broadcasted_iota(jnp.int32, x.shape, 1)
            x = jnp.where(lane < rem, x, 0.0)

        amt = shift % lc                                 # static python int
        # rolled[:, q] == x[:, q - shift] for q >= shift (wrap-around elsewhere; the
        # wrapped head lanes are killed by coef_a == 0 at s == 0 positions).
        rolled = pltpu.roll(x, shift=amt, axis=1) if amt else x

        coef = coef_ref[...]                             # (1, LC)
        scale = scale_ref[...]                           # (1, LC)

        if multi_chunk:
            (carry_ref,) = scratch
            head = rolled[:, :cw]                        # (TT, CW) -- head column only
            lane_h = lax.broadcasted_iota(jnp.int32, head.shape, 1)
            use_carry = jnp.logical_and(lane_h < shift, j > 0)
            prev_head = jnp.where(use_carry, carry_ref[...], head)
            carry_ref[...] = head                        # carry for chunk j + 1
        else:
            prev_head = rolled[:, :cw]

        # Head columns (first CW lanes): may mix in the carry.
        zh = (x[:, :cw] - coef[:, :cw] * prev_head) * scale[:, :cw]
        acc = jnp.sum(zh * zh, axis=1, keepdims=True)
        # Tail columns: plain rolled previous values, no carry / select / iota work.
        if cw < lc:
            zt = (x[:, cw:] - coef[:, cw:] * rolled[:, cw:]) * scale[:, cw:]
            acc = acc + jnp.sum(zt * zt, axis=1, keepdims=True)

        out_ref[...] += -0.5 * acc

    if rem is None:
        # Every chunk is full width: no masking anywhere.
        accumulate(False)
    else:
        @pl.when(j < n_chunks - 1)
        def _full():
            accumulate(False)

        @pl.when(j == n_chunks - 1)
        def _ragged():
            accumulate(True)


@functools.partial(jax.jit, static_argnames=("initial", "block_bytes"))
def ar1_log_p(x, loc_raw, finv_std, initial=True, block_bytes=None):
    """AR1.log_p.  x: (trials, tsteps, dims); loc_raw/finv_std: (dims,) -> (trials,)."""
    T, S, D = x.shape
    L = S * D
    tb = _TARGET_BLOCK_BYTES if block_bytes is None else int(block_bytes)

    a = jax.nn.sigmoid(loc_raw.astype(jnp.float32))          # AR(1) coefficient
    std = jax.nn.softplus(finv_std.astype(jnp.float32))      # stationary std
    std_ = std * jnp.sqrt(1.0 - a * a)                       # innovation std
    inv_std = 1.0 / std
    inv_std_ = 1.0 / std_

    # Gaussian log-normalization folded into one scalar (added after the kernel).
    total_const = (S - 1) * jnp.sum(-jnp.log(std_) - _HALF_LOG_2PI)
    if initial:
        total_const = total_const + jnp.sum(-jnp.log(std) - _HALF_LOG_2PI)

    # ---- tiling ----
    lc_min = max(_LANE, _round_up(D, _LANE))   # single-roll carry needs lc >= D
    l_full = _round_up(L, _LANE)

    # Trial tile: aim for >= 2 trial blocks so the 'parallel' axis can be sharded
    # across v7x's two TensorCores (harmless extra grid steps on 1-core chips), and
    # shrink it (down to 8) if a huge D would otherwise blow the per-block budget.
    tt_budget = max(_SUBLANE, (tb // (4 * lc_min)) // _SUBLANE * _SUBLANE)
    tt_half = _round_up(max(1, _cdiv(T, 2)), _SUBLANE)
    tt = max(_SUBLANE, min(256, tt_budget, tt_half))
    n_tblocks = _cdiv(T, tt)

    # Lane chunk: fill the remaining block budget (>= lc_min, <= whole padded row).
    lc = (tb // (tt * 4)) // _LANE * _LANE
    lc = min(l_full, max(lc_min, lc))
    n_chunks = _cdiv(L, lc)
    multi_chunk = n_chunks > 1
    rem = L - (n_chunks - 1) * lc              # valid lanes in the last chunk
    ragged = rem < lc
    cw = min(_round_up(D, _LANE), lc)          # carry / head width (128-aligned)
    l_pad = n_chunks * lc

    # x is NOT padded or copied: (T, S, D) -> (T, L) is a free bitcast reshape.
    # Ragged edges are masked inside the kernel instead of materializing a pad.
    xf = x.reshape(T, L)

    # Hoisted per-position parameter vectors (tiny (1, l_pad) arrays).
    p = jnp.arange(l_pad)
    d_idx = p % D
    is_rw = (p >= D) & (p < L)                 # random-walk positions (s >= 1)
    is_ini = p < D                             # initial positions (s == 0)
    coef_a = jnp.where(is_rw, a[d_idx], 0.0).astype(jnp.float32)[None, :]
    ini_scale = inv_std[d_idx] if initial else 0.0
    inv_scale = jnp.where(
        is_rw, inv_std_[d_idx], jnp.where(is_ini, ini_scale, 0.0)
    ).astype(jnp.float32)[None, :]

    kernel = functools.partial(
        _ar1_kernel, shift=D, cw=cw, multi_chunk=multi_chunk,
        n_chunks=n_chunks, rem=(rem if ragged else None))

    out = pl.pallas_call(
        kernel,
        out_shape=jax.ShapeDtypeStruct((T, _LANE), jnp.float32),
        grid=(n_tblocks, n_chunks),            # chunk axis MUST stay innermost (carry)
        in_specs=[
            pl.BlockSpec((tt, lc), lambda i, j: (i, j)),     # x chunk
            pl.BlockSpec((1, lc), lambda i, j: (0, j)),      # coef_a chunk
            pl.BlockSpec((1, lc), lambda i, j: (0, j)),      # inv_scale chunk
        ],
        out_specs=pl.BlockSpec((tt, _LANE), lambda i, j: (i, 0)),
        scratch_shapes=(
            [pltpu.VMEM((tt, cw), jnp.float32)] if multi_chunk else []
        ),
        compiler_params=pltpu.CompilerParams(
            dimension_semantics=("parallel", "arbitrary"),
            vmem_limit_bytes=_VMEM_LIMIT_BYTES),
    )(xf, coef_a, inv_scale)

    return out[:, 0] + total_const


def _reference_log_p(x, loc_raw, finv_std, initial=True):
    """Pure-JAX reference mirroring the PyTorch module."""
    a = jax.nn.sigmoid(loc_raw)
    std = jax.nn.softplus(finv_std)
    std_ = std * jnp.sqrt(1.0 - a * a)
    z = (x[:, 1:, :] - a * x[:, :-1, :]) / std_
    rw = jnp.sum(-0.5 * z * z - jnp.log(std_) - _HALF_LOG_2PI, axis=(1, 2))
    if initial:
        z0 = x[:, :1, :] / std
        rw = rw + jnp.sum(-0.5 * z0 * z0 - jnp.log(std) - _HALF_LOG_2PI, axis=(1, 2))
    return rw


if __name__ == "__main__":
    key = jax.random.PRNGKey(0)

    def make_case(k, trials, tsteps, dims):
        kx, kl, ks = jax.random.split(k, 3)
        x = jax.random.normal(kx, (trials, tsteps, dims), dtype=jnp.float32)
        # Parameters mirroring AR1.__init__: loc is stored raw (sigmoid in forward);
        # finv_std = softplus^{-1}(std).
        loc_param = 0.1 * jax.random.normal(kl, (dims,), dtype=jnp.float32)
        std_init = 0.5 + jax.nn.softplus(
            jax.random.normal(ks, (dims,), dtype=jnp.float32))
        finv_std = jnp.where(std_init > 30.0, std_init, jnp.log(jnp.expm1(std_init)))
        return x, loc_param, finv_std

    k1, k2, k3 = jax.random.split(key, 3)

    # Case 1: canonical small case (lane-aligned, single chunk, single trial block).
    x, loc_p, fs = make_case(k1, 2, 16, 8)
    out = jax.block_until_ready(ar1_log_p(x, loc_p, fs, initial=True))
    ref = _reference_log_p(x, loc_p, fs, initial=True)
    assert out.shape == (2,)
    assert jnp.allclose(out, ref, rtol=1e-5, atol=1e-4), (out, ref)

    # Case 2: ragged lanes (L % 128 != 0) and ragged trial block -> in-kernel masking.
    x, loc_p, fs = make_case(k2, 3, 10, 6)
    out = jax.block_until_ready(ar1_log_p(x, loc_p, fs, initial=True))
    ref = _reference_log_p(x, loc_p, fs, initial=True)
    assert jnp.allclose(out, ref, rtol=1e-5, atol=1e-4), (out, ref)

    # Case 3: tiny block budget forces the multi-chunk carry path (cw == lc), ragged
    # last chunk, initial=False.
    x, loc_p, fs = make_case(k3, 3, 40, 8)
    out = jax.block_until_ready(ar1_log_p(x, loc_p, fs, initial=False,
                                          block_bytes=4096))
    ref = _reference_log_p(x, loc_p, fs, initial=False)
    assert jnp.allclose(out, ref, rtol=1e-5, atol=1e-4), (out, ref)

    # Case 4: multi-chunk with a tail region past the carry head (cw < lc).
    out = jax.block_until_ready(ar1_log_p(x, loc_p, fs, initial=True,
                                          block_bytes=8192))
    ref = _reference_log_p(x, loc_p, fs, initial=True)
    assert jnp.allclose(out, ref, rtol=1e-5, atol=1e-4), (out, ref)

    print("KERNEL_OK")
</pallas_src>

<mosaic_0001>
module attributes {stable_mosaic.version = 11 : i64} {
  func.func @_ar1_kernel(%arg0: i32, %arg1: i32, %arg2: memref<8x128xf32, #tpu.memory_space<vmem>>, %arg3: memref<1x128xf32, #tpu.memory_space<vmem>>, %arg4: memref<1x128xf32, #tpu.memory_space<vmem>>, %arg5: memref<8x128xf32, #tpu.memory_space<vmem>>) attributes {dimension_semantics = [#tpu.dimension_semantics<parallel>, #tpu.dimension_semantics<arbitrary>], iteration_bounds = array<i64: 1, 1>, scalar_prefetch = 0 : i64, scratch_operands = 0 : i64, tpu.core_type = #tpu.core_type<tc>, window_params = [{transform_indices = @transform_0, window_bounds = array<i64: 8, 128>}, {transform_indices = @transform_1, window_bounds = array<i64: 1, 128>}, {transform_indices = @transform_2, window_bounds = array<i64: 1, 128>}, {transform_indices = @transform_3, window_bounds = array<i64: 8, 128>}]} {
    %c0_i32 = arith.constant 0 : i32
    %0 = arith.cmpi eq, %arg1, %c0_i32 : i32
    %1 = arith.extui %0 : i1 to i32
    %c0_i32_0 = arith.constant 0 : i32
    %2 = arith.cmpi ne, %1, %c0_i32_0 : i32
    scf.if %2 {
      %cst_11 = arith.constant 0.000000e+00 : f32
      %21 = vector.broadcast %cst_11 : f32 to vector<8x128xf32>
      %c0_12 = arith.constant 0 : index
      %c0_13 = arith.constant 0 : index
      %22 = vector.load %arg5[%c0_12, %c0_13] : memref<8x128xf32, #tpu.memory_space<vmem>>, vector<8x128xf32>
      tpu.vector_store %arg5[%c0_12, %c0_13], %21 {strides = array<i32>} : memref<8x128xf32, #tpu.memory_space<vmem>>, vector<8x128xf32>,
    } else {
    }
    %c0 = arith.constant 0 : index
    %c0_1 = arith.constant 0 : index
    %3 = vector.load %arg2[%c0, %c0_1] : memref<8x128xf32, #tpu.memory_space<vmem>>, vector<8x128xf32>
    %c8_i32 = arith.constant 8 : i32
    %4 = tpu.dynamic_rotate %3 by %c8_i32 dim 1 : vector<8x128xf32>, i32 -> vector<8x128xf32>
    %c0_2 = arith.constant 0 : index
    %c0_3 = arith.constant 0 : index
    %5 = vector.load %arg3[%c0_2, %c0_3] : memref<1x128xf32, #tpu.memory_space<vmem>>, vector<1x128xf32>
    %c0_4 = arith.constant 0 : index
    %c0_5 = arith.constant 0 : index
    %6 = vector.load %arg4[%c0_4, %c0_5] : memref<1x128xf32, #tpu.memory_space<vmem>>, vector<1x128xf32>
    %7 = vector.broadcast %5 : vector<1x128xf32> to vector<8x128xf32>
    %8 = arith.mulf %7, %4 : vector<8x128xf32>
    %9 = arith.subf %3, %8 : vector<8x128xf32>
    %10 = vector.broadcast %6 : vector<1x128xf32> to vector<8x128xf32>
    %11 = arith.mulf %9, %10 : vector<8x128xf32>
    %12 = arith.mulf %11, %11 : vector<8x128xf32>
    %cst = arith.constant dense<0.000000e+00> : vector<8xf32>
    %13 = vector.multi_reduction <add>, %12, %cst [1] : vector<8x128xf32> to vector<8xf32>
    %14 = vector.shape_cast %13 : vector<8xf32> to vector<8x1xf32>
    %c0_6 = arith.constant 0 : index
    %c0_7 = arith.constant 0 : index
    %15 = vector.load %arg5[%c0_6, %c0_7] : memref<8x128xf32, #tpu.memory_space<vmem>>, vector<8x128xf32>
    %cst_8 = arith.constant -5.000000e-01 : f32
    %16 = vector.broadcast %cst_8 : f32 to vector<8x1xf32>
    %17 = arith.mulf %16, %14 : vector<8x1xf32>
    %18 = vector.broadcast %17 : vector<8x1xf32> to vector<8x128xf32>
    %19 = arith.addf %15, %18 : vector<8x128xf32>
    %c0_9 = arith.constant 0 : index
    %c0_10 = arith.constant 0 : index
    %20 = vector.load %arg5[%c0_9, %c0_10] : memref<8x128xf32, #tpu.memory_space<vmem>>, vector<8x128xf32>
    tpu.vector_store %arg5[%c0_9, %c0_10], %19 {strides = array<i32>} : memref<8x128xf32, #tpu.memory_space<vmem>>, vector<8x128xf32>,
    return
  }
  func.func @transform_0(%arg0: i32, %arg1: i32) -> (i32, i32) {
    %c0_i32 = arith.constant 0 : i32
    return %arg0, %arg1 : i32, i32
  }
  func.func @transform_1(%arg0: i32, %arg1: i32) -> (i32, i32) {
    %c0_i32 = arith.constant 0 : i32
    %c0_i32_0 = arith.constant 0 : i32
    return %c0_i32, %arg1 : i32, i32
  }
  func.func @transform_2(%arg0: i32, %arg1: i32) -> (i32, i32) {
    %c0_i32 = arith.constant 0 : i32
    %c0_i32_0 = arith.constant 0 : i32
    return %c0_i32, %arg1 : i32, i32
  }
  func.func @transform_3(%arg0: i32, %arg1: i32) -> (i32, i32) {
    %c0_i32 = arith.constant 0 : i32
    %c0_i32_0 = arith.constant 0 : i32
    return %arg0, %c0_i32 : i32, i32
  }
}

</mosaic_0001>

<bundles_post_ra>
// kernel: ar1_log_p.1
= control target key start
LH: loop header
LB: loop body
LE: loop exit
PB: predicated region body
PF: predicated region fallthrough
CT: control target
= control target key end

     0   :  { %s89_s14 = smov 8   ;;  %s122_s0 = inlined_call_operand.vmem [shape: f32[2,128], index: 0, kind: input, shape index: {}]   ;;  %s123_s1 = inlined_call_operand.vmem [shape: f32[1,128], index: 1, kind: input, shape index: {}]   ;;  %s124_s2 = inlined_call_operand.vmem [shape: f32[1,128], index: 2, kind: input, shape index: {}]   ;;  %s125_s3 = inlined_call_operand.vmem [shape: f32[2,128], index: 3, kind: output, shape index: {}]  }
   0x1   :  { %v19_v0 = vld [vmem:[%s122_s0] sm:$0xff] }
   0x2   :  { %20 = vrot.lane.b32.xlu0 %v19_v0, %s89_s14  ;;  %v85_v1 = vld [vmem:[%s123_s1] ss:$0 sm:$0xff] }
   0x3   :  { %v86_v4 = vld [vmem:[%s124_s2] ss:$0 sm:$0xff] }
  0x74   :  { %v21_v2 = vpop.permute.xlu0 %20 }
  0x75   :  { %v30_v3 = vmul.f32 %v85_v1, %v21_v2 }
  0x77   :  { %v31_v5 = vsub.f32 %v19_v0, %v30_v3 }
  0x79   :  { %v38_v6 = vmul.f32 %v86_v4, %v31_v5 }
  0x7b   :  { %v39_v7 = vmul.f32 %v38_v6, %v38_v6 }
  0x7d   :  { %40 = vadd.xlane.f32.xlu0 %v39_v7 }
 0x10a   :  { %v41_v8 = vpop.xlane.xlu0 %40 }
 0x10b   :  { %v43_v9 = vmul.f32 -0.5, %v41_v8 }
 0x10d   :  { %45 = vst [vmem:[#allocation2] sm:$0xff] %v43_v9 }
 0x114   :  { %v63_v10 = vld [vmem:[#allocation2] sm:$0x3] }
 0x115   :  { %64 = vst [vmem:[%s125_s3] sm:$0x3] %v63_v10 }

</bundles_post_ra>
